<compile_context>
chip_gen: v6e
topology: v6e:2x2x1
jax: 0.10.0
libtpu: 0.0.40
codegen_flags: <defaults>
</compile_context>

<pallas_src>
import jax
import jax.numpy as jnp
from jax.experimental import pallas as pl
from jax.experimental.pallas import tpu as pltpu


def _round_up(x, m):
    return ((x + m - 1) // m) * m


def dqn_kernel(x_ref, w1_ref, b1_ref, w2_ref, b2_ref, out_ref):
    # x: [TB, in] f32 (cast to bf16 in-kernel; free VPU filler under HBM roof)
    # w1: [in, H_PAD] bf16, b1: [1, H_PAD] f32
    # w2: [H_PAD, out] bf16, b2: [1, out] f32, out: [TB, out] f32
    x = x_ref[...].astype(jnp.bfloat16)
    # MXU matmul 1, f32 accumulation.
    h = jnp.dot(x, w1_ref[...], preferred_element_type=jnp.float32)
    # Bias + ReLU in f32 on the VPU (v5e-safe: no bf16 VPU there).
    h = jnp.maximum(h + b1_ref[...], 0.0)
    # MXU matmul 2 (bf16 inputs, f32 accumulation, narrow N = out_size).
    y = jnp.dot(h.astype(jnp.bfloat16), w2_ref[...],
                preferred_element_type=jnp.float32)
    out_ref[...] = (y + b2_ref[...]).astype(out_ref.dtype)


def prepare_params(w1, b1, w2, b2):
    """One-time param prep (hoisted out of the per-step forward).

    Pads hidden 64 -> 128 (lane-dense intermediate, resident in VMEM so the
    pad costs no HBM traffic per call), keeps the output dim unpadded, and
    stores weights as bf16 / biases as f32 rows.
    """
    in_size, hidden = w1.shape
    out_size = w2.shape[1]
    h_pad = _round_up(hidden, 128)

    w1_p = jnp.zeros((in_size, h_pad), jnp.bfloat16)
    w1_p = w1_p.at[:, :hidden].set(w1.astype(jnp.bfloat16))
    b1_p = jnp.zeros((1, h_pad), jnp.float32)
    b1_p = b1_p.at[:, :hidden].set(b1.reshape(1, -1).astype(jnp.float32))
    w2_p = jnp.zeros((h_pad, out_size), jnp.bfloat16)
    w2_p = w2_p.at[:hidden, :].set(w2.astype(jnp.bfloat16))
    b2_p = b2.reshape(1, -1).astype(jnp.float32)
    return w1_p, b1_p, w2_p, b2_p


def dqn_forward(state, params, *, block_b=2048):
    """state: [B, input_size] f32; params from prepare_params.

    Returns [B, output_size] f32 == relu(state @ w1 + b1) @ w2 + b2, with
    state/weights rounded to bf16 for the matmuls, f32 accumulation.
    """
    w1_p, b1_p, w2_p, b2_p = params
    B, in_size = state.shape
    h_pad = w1_p.shape[1]
    out_size = w2_p.shape[1]
    assert w1_p.shape[0] == in_size and b1_p.shape == (1, h_pad)
    assert w2_p.shape == (h_pad, out_size) and b2_p.shape == (1, out_size)

    # Batch tile: multiple of 8 sublanes; split into >= 2 blocks when possible
    # so the "parallel" batch axis can use both TensorCores on v7x.
    TB = max(8, min(block_b, _round_up((B + 1) // 2, 8)))
    grid_b = pl.cdiv(B, TB)

    flops = 2 * B * in_size * h_pad + 2 * B * h_pad * out_size
    bytes_accessed = (B * in_size * 4 + B * out_size * 4 +
                      w1_p.size * 2 + w2_p.size * 2 +
                      b1_p.size * 4 + b2_p.size * 4)

    out = pl.pallas_call(
        dqn_kernel,
        out_shape=jax.ShapeDtypeStruct((B, out_size), jnp.float32),
        grid=(grid_b,),
        in_specs=[
            pl.BlockSpec((TB, in_size), lambda i: (i, 0)),     # streamed batch
            pl.BlockSpec((in_size, h_pad), lambda i: (0, 0)),  # resident W1
            pl.BlockSpec((1, h_pad), lambda i: (0, 0)),        # resident b1
            pl.BlockSpec((h_pad, out_size), lambda i: (0, 0)),  # resident W2
            pl.BlockSpec((1, out_size), lambda i: (0, 0)),      # resident b2
        ],
        out_specs=pl.BlockSpec((TB, out_size), lambda i: (i, 0)),
        compiler_params=pltpu.CompilerParams(
            dimension_semantics=("parallel",),      # rows are independent
            vmem_limit_bytes=32 * 1024 * 1024,
        ),
        cost_estimate=pl.CostEstimate(
            flops=flops, transcendentals=0, bytes_accessed=bytes_accessed),
    )(state, w1_p, b1_p, w2_p, b2_p)

    return out


def init_params(key, input_size, hidden, output_size):
    # Deterministic synthetic init (PyTorch-Linear-style uniform bounds).
    k1, k2, k3, k4 = jax.random.split(key, 4)
    bound1 = 1.0 / jnp.sqrt(input_size)
    bound2 = 1.0 / jnp.sqrt(hidden)
    w1 = jax.random.uniform(k1, (input_size, hidden), jnp.float32,
                            -bound1, bound1)
    b1 = jax.random.uniform(k2, (hidden,), jnp.float32, -bound1, bound1)
    w2 = jax.random.uniform(k3, (hidden, output_size), jnp.float32,
                            -bound2, bound2)
    b2 = jax.random.uniform(k4, (output_size,), jnp.float32, -bound2, bound2)
    return w1, b1, w2, b2


if __name__ == "__main__":
    B, INPUT_SIZE, HIDDEN, OUTPUT_SIZE = 8, 32, 64, 8

    key = jax.random.PRNGKey(0)
    kx, kp = jax.random.split(key)
    state = jax.random.normal(kx, (B, INPUT_SIZE), jnp.float32)
    w1, b1, w2, b2 = init_params(kp, INPUT_SIZE, HIDDEN, OUTPUT_SIZE)

    params = prepare_params(w1, b1, w2, b2)   # one-time, hoisted out of forward
    out = dqn_forward(state, params)
    out = jax.block_until_ready(out)

    # Reference: same math with matching bf16 storage/operand rounding,
    # f32 accumulation.  (Callers wanting exact f32 PyTorch parity should keep
    # the operands in f32; here bf16 operands are an intentional perf choice.)
    q = lambda a: a.astype(jnp.bfloat16).astype(jnp.float32)
    h_ref = jnp.maximum(q(state) @ q(w1) + b1, 0.0)
    ref = q(h_ref) @ q(w2) + b2

    assert out.shape == (B, OUTPUT_SIZE)
    assert jnp.allclose(out, ref, atol=5e-3, rtol=5e-3), \
        float(jnp.max(jnp.abs(out - ref)))

    print("KERNEL_OK")
</pallas_src>

<mosaic_0001>
module attributes {stable_mosaic.version = 11 : i64} {
  func.func @dqn_kernel(%arg0: i32, %arg1: memref<8x32xf32, #tpu.memory_space<vmem>>, %arg2: memref<32x128xbf16, #tpu.memory_space<vmem>>, %arg3: memref<1x128xf32, #tpu.memory_space<vmem>>, %arg4: memref<128x8xbf16, #tpu.memory_space<vmem>>, %arg5: memref<1x8xf32, #tpu.memory_space<vmem>>, %arg6: memref<8x8xf32, #tpu.memory_space<vmem>>) attributes {dimension_semantics = [#tpu.dimension_semantics<parallel>], iteration_bounds = array<i64: 1>, scalar_prefetch = 0 : i64, scratch_operands = 0 : i64, tpu.core_type = #tpu.core_type<tc>, window_params = [{transform_indices = @transform_0, window_bounds = array<i64: 8, 32>}, {pipeline_mode = #tpu.pipeline_mode<synchronous>, transform_indices = @transform_1, window_bounds = array<i64: 32, 128>}, {pipeline_mode = #tpu.pipeline_mode<synchronous>, transform_indices = @transform_2, window_bounds = array<i64: 1, 128>}, {pipeline_mode = #tpu.pipeline_mode<synchronous>, transform_indices = @transform_3, window_bounds = array<i64: 128, 8>}, {pipeline_mode = #tpu.pipeline_mode<synchronous>, transform_indices = @transform_4, window_bounds = array<i64: 1, 8>}, {transform_indices = @transform_5, window_bounds = array<i64: 8, 8>}]} {
    %c0 = arith.constant 0 : index
    %c0_0 = arith.constant 0 : index
    %0 = vector.load %arg1[%c0, %c0_0] : memref<8x32xf32, #tpu.memory_space<vmem>>, vector<8x32xf32>
    %1 = arith.truncf %0 : vector<8x32xf32> to vector<8x32xbf16>
    %c0_1 = arith.constant 0 : index
    %c0_2 = arith.constant 0 : index
    %2 = vector.load %arg2[%c0_1, %c0_2] : memref<32x128xbf16, #tpu.memory_space<vmem>>, vector<32x128xbf16>
    %cst = arith.constant dense<0.000000e+00> : vector<8x128xf32>
    %3 = tpu.matmul %1, %2, %cst {dimension_numbers = #tpu.dot_dimension_numbers<[1], [0], [0], [1], [0, 0, 1, 1], [], []>} : vector<8x32xbf16>, vector<32x128xbf16>, vector<8x128xf32> -> vector<8x128xf32>
    %c0_3 = arith.constant 0 : index
    %c0_4 = arith.constant 0 : index
    %4 = vector.load %arg3[%c0_3, %c0_4] : memref<1x128xf32, #tpu.memory_space<vmem>>, vector<1x128xf32>
    %5 = vector.broadcast %4 : vector<1x128xf32> to vector<8x128xf32>
    %6 = arith.addf %3, %5 : vector<8x128xf32>
    %cst_5 = arith.constant 0.000000e+00 : f32
    %7 = vector.broadcast %cst_5 : f32 to vector<8x128xf32>
    %8 = arith.maximumf %6, %7 : vector<8x128xf32>
    %9 = arith.truncf %8 : vector<8x128xf32> to vector<8x128xbf16>
    %c0_6 = arith.constant 0 : index
    %c0_7 = arith.constant 0 : index
    %10 = vector.load %arg4[%c0_6, %c0_7] : memref<128x8xbf16, #tpu.memory_space<vmem>>, vector<128x8xbf16>
    %cst_8 = arith.constant dense<0.000000e+00> : vector<8x8xf32>
    %11 = tpu.matmul %9, %10, %cst_8 {dimension_numbers = #tpu.dot_dimension_numbers<[1], [0], [0], [1], [0, 0, 1, 1], [], []>} : vector<8x128xbf16>, vector<128x8xbf16>, vector<8x8xf32> -> vector<8x8xf32>
    %c0_9 = arith.constant 0 : index
    %c0_10 = arith.constant 0 : index
    %12 = vector.load %arg5[%c0_9, %c0_10] : memref<1x8xf32, #tpu.memory_space<vmem>>, vector<1x8xf32>
    %13 = vector.broadcast %12 : vector<1x8xf32> to vector<8x8xf32>
    %14 = arith.addf %11, %13 : vector<8x8xf32>
    %c0_11 = arith.constant 0 : index
    %c0_12 = arith.constant 0 : index
    %15 = vector.load %arg6[%c0_11, %c0_12] : memref<8x8xf32, #tpu.memory_space<vmem>>, vector<8x8xf32>
    tpu.vector_store %arg6[%c0_11, %c0_12], %14 {strides = array<i32>} : memref<8x8xf32, #tpu.memory_space<vmem>>, vector<8x8xf32>,
    return
  }
  func.func @transform_0(%arg0: i32) -> (i32, i32) {
    %c0_i32 = arith.constant 0 : i32
    %c0_i32_0 = arith.constant 0 : i32
    return %arg0, %c0_i32 : i32, i32
  }
  func.func @transform_1(%arg0: i32) -> (i32, i32) {
    %c0_i32 = arith.constant 0 : i32
    %c0_i32_0 = arith.constant 0 : i32
    %c0_i32_1 = arith.constant 0 : i32
    return %c0_i32, %c0_i32_0 : i32, i32
  }
  func.func @transform_2(%arg0: i32) -> (i32, i32) {
    %c0_i32 = arith.constant 0 : i32
    %c0_i32_0 = arith.constant 0 : i32
    %c0_i32_1 = arith.constant 0 : i32
    return %c0_i32, %c0_i32_0 : i32, i32
  }
  func.func @transform_3(%arg0: i32) -> (i32, i32) {
    %c0_i32 = arith.constant 0 : i32
    %c0_i32_0 = arith.constant 0 : i32
    %c0_i32_1 = arith.constant 0 : i32
    return %c0_i32, %c0_i32_0 : i32, i32
  }
  func.func @transform_4(%arg0: i32) -> (i32, i32) {
    %c0_i32 = arith.constant 0 : i32
    %c0_i32_0 = arith.constant 0 : i32
    %c0_i32_1 = arith.constant 0 : i32
    return %c0_i32, %c0_i32_0 : i32, i32
  }
  func.func @transform_5(%arg0: i32) -> (i32, i32) {
    %c0_i32 = arith.constant 0 : i32
    %c0_i32_0 = arith.constant 0 : i32
    return %arg0, %c0_i32 : i32, i32
  }
}

</mosaic_0001>

<bundles_post_ra>
// kernel: tpu_custom_call.1
= control target key start
LH: loop header
LB: loop body
LE: loop exit
PB: predicated region body
PF: predicated region fallthrough
CT: control target
= control target key end

     0   :  { %v308_v1 = vmov 0.0   ;;  %vm309_vm0 = vmmov 0   ;;  %vm47_vm1 = vcmask 261120   ;;  %s383_s0 = inlined_call_operand.vmem [shape: f32[8,32], index: 0, kind: input, shape index: {}]   ;;  %s384_s1 = inlined_call_operand.vmem [shape: bf16[32,128], index: 1, kind: input, shape index: {}]   ;;  %s385_s2 = inlined_call_operand.vmem [shape: f32[1,128], index: 2, kind: input, shape index: {}]   ;;  %s386_s3 = inlined_call_operand.vmem [shape: bf16[128,8], index: 3, kind: input, shape index: {}]   ;;  %s387_s4 = inlined_call_operand.vmem [shape: f32[1,8], index: 4, kind: input, shape index: {}]   ;;  %s388_s5 = inlined_call_operand.hbm [shape: f32[8,8], index: 5, kind: output, shape index: {}]  }
   0x1   :  { %v276_v0 = vld [vmem:[%s384_s1 + $0x8] sm:$0xff]   ;;  %245 = vmatprep.subr.bf16.mxu0 %v308_v1  ;;  %v277_v2 = vld [vmem:[%s384_s1] sm:$0xff]   ;;  %253 = vmatprep.subr.bf16.mxu1 %v308_v1  ;;  %v278_v4 = vld [vmem:[%s386_s3 + $0x38] sm:$0xff]  }
   0x2   :  { %246 = vmatpush3.bf16.msra.mxu0 %v276_v0  ;;  %249 = vmatprep.mubr.msk.bf16.mxu0 %vm309_vm0, %v308_v1  ;;  %v22_v3 = vld [vmem:[%s383_s0] sm:$0xff]  ;;  %v279_v6 = vld [vmem:[%s386_s3 + $0x30] sm:$0xff]   ;;  %v280_v7 = vld [vmem:[%s386_s3 + $0x28] sm:$0xff]  }
   0x3   :  { %247 = vmatprep.subr.bf16.mxu0 %v308_v1  ;;  %269 = vmatprep.mubr.msk.bf16.mxu1 %vm309_vm0, %v308_v1  ;;  %v23_v5 = vpack.c.bf16 %v22_v3, %v22_v3 }
   0x4   :  { %254 = vmatpush3.bf16.msra.mxu1 %v278_v4 }
   0x5   :  { %255 = vmatprep.subr.bf16.mxu1 %v308_v1 }
   0x6   :  { %248 = vmatpush3.bf16.msra.mxu0 %v277_v2 }
   0x8   :  { %256 = vmatpush3.bf16.msra.mxu1 %v279_v6 }
   0x9   :  { %250 = vmatmul.mubr.msk.bf16.vlgmr.msra.gmra.mxu0 %vm47_vm1, %v23_v5  ;;  %257 = vmatprep.subr.bf16.mxu1 %v308_v1 }
   0xa   :  { %10 = vsyncpa [#allocation3], 0  ;;  %v281_v8 = vld [vmem:[%s386_s3 + $0x20] sm:$0xff]   ;;  %v282_v9 = vld [vmem:[%s386_s3 + $0x18] sm:$0xff]   ;;  %s310_s17 = smov [#allocation2]   ;;  %vm204_vm2 = vcmask 64512  }
   0xb   :  { %v283_v10 = vld [vmem:[%s386_s3 + $0x10] sm:$0xff]   ;;  %v284_v11 = vld [vmem:[%s386_s3 + $0x8] sm:$0xff]   ;;  %v285_v12 = vld [vmem:[%s386_s3] sm:$0xff]   ;;  %s212_s18 = sshll.u32 %s310_s17, 4  ;;  %s213_s18 = int_to_ptr.vmem [resolvable:$true] %s212_s18 }
   0xc   :  { %258 = vmatpush3.bf16.msra.mxu1 %v280_v7  ;;  %v220_v13 = vld [vmem:[%s385_s2] ss:$0 sm:$0xff]  ;;  %s286_s2 = scalar_lea.vmem %s213_s18, 128  ;;  %p291_p1 = scmp.lt.s32.totalorder %s213_s18, %s213_s18 }
   0xd   :  { %259 = vmatprep.subr.bf16.mxu1 %v308_v1  ;;  %v224_v21 = vld [vmem:[%s387_s4] ss:$0 sm:$0xff]  ;;  %p287_p0 = scmp.ne.s32.totalorder %s213_s18, %s286_s2  ;;  %p292_p2 = scmp.lt.s32.totalorder %s286_s2, %s286_s2 }
   0xf   :  { %p293_p3 = por %p292_p2, %p291_p1 }
  0x10   :  { %260 = vmatpush3.bf16.msra.mxu1 %v281_v8 }
  0x11   :  { %261 = vmatprep.subr.bf16.mxu1 %v308_v1  ;;  %p294_p4 = pnand %p293_p3, %p287_p0 }
  0x14   :  { %262 = vmatpush3.bf16.msra.mxu1 %v282_v9 }
  0x15   :  { %263 = vmatprep.subr.bf16.mxu1 %v308_v1 }
  0x18   :  { %264 = vmatpush3.bf16.msra.mxu1 %v283_v10 }
  0x19   :  { %265 = vmatprep.subr.bf16.mxu1 %v308_v1 }
  0x1c   :  { %266 = vmatpush3.bf16.msra.mxu1 %v284_v11 }
  0x1d   :  { %267 = vmatprep.subr.bf16.mxu1 %v308_v1 }
  0x20   :  { %268 = vmatpush3.bf16.msra.mxu1 %v285_v12 }
  0xc9   :  { %v85_v14 = vpop.f32.mrf.mxu0 }
  0xca   :  { %v86_v15 = vadd.f32 %v220_v13, %v85_v14 }
  0xcb   :  { %v251_v16 = vpop.f32.mrf.mxu0 }
  0xcc   :  { %v91_v17 = vmax.f32 %v86_v15, 0.0 }
  0xcd   :  { %v88_v18 = vpop.f32.mrf.mxu0 }
  0xce   :  { %v92_v19 = vpack.c.bf16 %v91_v17, %v91_v17 }
  0xcf   :  { %v252_v20 = vpop.f32.mrf.mxu0 }
  0xd0   :  { %270 = vmatmul.mubr.bf16.vlgmr.msra.gmra.mxu1 %v92_v19 }
 0x190   :  { %v198_v22 = vpop.f32.mrf.mxu1 }
 0x191   :  { %v199_v23 = vadd.f32 %v224_v21, %v198_v22 }
 0x192   :  { %v271_v24 = vpop.f32.mrf.mxu1 }
 0x193   :  { %205 = vst.msk [vmem:[#allocation2] sm:$0xff] %vm204_vm2, %v199_v23 }
 0x194   :  { %v201_v25 = vpop.f32.mrf.mxu1 }
 0x195   :  { %297 = shalt.err (!%p294_p4)
}
 0x196   :  { %215 = dma.vmem_to_hbm [thread:$0]  %s213_s18, 128, %s388_s5, [#allocation3]   ;;  %v272_v26 = vpop.f32.mrf.mxu1 }
 0x197   :  { %306 = dma.done.wait [#allocation3], 128  }
 0x198   :  { %307 = vsyncadd [#allocation3], 4294967168 }
 0x199   :  { %219 = vsyncpa [#allocation3], 1 }

</bundles_post_ra>
